<compile_context>
chip_gen: v7x
topology: tpu7x:2x2x1
jax: 0.10.0
libtpu: 0.0.40
codegen_flags: <defaults>
</compile_context>

<pallas_src>
import functools

import numpy as np

import jax
import jax.numpy as jnp
from jax.experimental import pallas as pl
from jax.experimental.pallas import tpu as pltpu


# ---------------------------------------------------------------------------
# Rational-form Lanczos lgamma (valid for z > 0, float32).
# ser(z) = c0 + sum_k cof[k]/(z+k)  ==  P(z)/Q(z), Q(z) = prod_{k=1..6}(z+k).
# Coefficients of P, Q are precomputed in float64; all are positive, so the
# f32 Horner evaluation is well conditioned for z > 0.
# ---------------------------------------------------------------------------
_SQRT_2PI = 2.5066282746310005


def _lanczos_rational_coeffs():
    cof = [76.18009172947146, -86.50532032941677, 24.01409824083091,
           -1.231739572450155, 0.1208650973866179e-2, -0.5395239384953e-5]
    q = np.poly1d([1.0])
    for k in range(1, 7):
        q = q * np.poly1d([1.0, float(k)])
    p = 1.000000000190015 * q
    for k in range(1, 7):
        r = np.poly1d([1.0])
        for j in range(1, 7):
            if j != k:
                r = r * np.poly1d([1.0, float(j)])
        p = p + cof[k - 1] * r
    return tuple(float(c) for c in p.coeffs), tuple(float(c) for c in q.coeffs)


_LANCZOS_P, _LANCZOS_Q = _lanczos_rational_coeffs()


def _lgamma_pos(z):
    """lgamma(z) for z > 0 (f32).  3 transcendentals; polynomials on the VPU."""
    zp = z + 5.5
    p = jnp.full_like(z, jnp.float32(_LANCZOS_P[0]))
    for c in _LANCZOS_P[1:]:
        p = p * z + jnp.float32(c)
    q = jnp.full_like(z, jnp.float32(_LANCZOS_Q[0]))
    for c in _LANCZOS_Q[1:]:
        q = q * z + jnp.float32(c)
    # lgamma(z) = (z+0.5)*log(z+5.5) - (z+5.5) + log(sqrt(2*pi)*P) - log(Q*z)
    return (z + 0.5) * jnp.log(zp) - zp \
        + jnp.log(jnp.float32(_SQRT_2PI) * p) - jnp.log(q * z)


# ---------------------------------------------------------------------------
# Kernel: one batch tile -> (8, C) partial sums.
# ---------------------------------------------------------------------------
def _zinb_kernel(x_ref, mean_ref, disp_ref, pi_ref, out_ref,
                 *, ridge_lambda, n_rows, block_rows):
    i = pl.program_id(0)

    x = x_ref[...].astype(jnp.float32)
    mu = mean_ref[...].astype(jnp.float32)
    disp = disp_ref[...].astype(jnp.float32)
    pi = pi_ref[...].astype(jnp.float32)

    eps = jnp.float32(1e-10)

    # Shared logs (log-identity fusion: 3 logs replace 2 logs + 2 divides + pow base).
    log_disp = jnp.log(disp + eps)
    log_mu = jnp.log(mu + eps)
    log_dm = jnp.log(disp + mu + eps)

    # t1 = lgamma(disp+eps) + lgamma(x+1) - lgamma(x+disp+eps)
    t1 = _lgamma_pos(disp + eps) + _lgamma_pos(x + 1.0) - _lgamma_pos(x + disp + eps)
    # t2 = (disp+x)*log(1 + mu/(disp+eps)) + x*(log(disp+eps) - log(mu+eps))
    t2 = (disp + x) * (log_dm - log_disp) + x * (log_disp - log_mu)
    nb_case = t1 + t2 - jnp.log(1.0 - pi + eps)

    # zero_nb = ((disp+eps)/(disp+mu+eps))**disp   (== 1 at disp == 0, like torch.pow(0,0))
    zero_nb = jnp.exp(disp * (log_disp - log_dm))
    zero_case = -jnp.log(pi + (1.0 - pi) * zero_nb + eps)

    result = jnp.where(x <= 1e-08, zero_case, nb_case)
    if ridge_lambda > 0:  # static branch, same as the PyTorch `if`
        result = result + jnp.float32(ridge_lambda) * jnp.square(pi)

    # Mask rows beyond the true batch size (ragged last tile / cdiv grid).
    row = jax.lax.broadcasted_iota(jnp.int32, result.shape, 0) + i * block_rows
    result = jnp.where(row < n_rows, result, jnp.float32(0.0))

    # Per-tile partial sums: fold sublane-groups with pure VPU adds; the final
    # lane/tile collapse happens once, in plain JAX, outside the kernel.
    br, c = result.shape
    out_ref[...] = jnp.sum(result.reshape(br // 8, 8, c), axis=0)


# ---------------------------------------------------------------------------
# Wrapper
# ---------------------------------------------------------------------------
def zinb_loss(x, mean, disp, pi, scale_factor=1.0, ridge_lambda=0.0,
              block_rows=512):
    """Pallas implementation of ZINBLoss.forward. Returns an f32 scalar."""
    del scale_factor  # unused in the reference forward
    assert x.shape == mean.shape == disp.shape == pi.shape
    assert x.ndim == 2
    R, C = x.shape

    # Tile sizing: 4 inputs x 2 pipeline buffers x f32 must fit a ~24 MiB
    # budget (safe on v5e/v6e 128 MiB and v7x 64 MiB VMEM); scoped limit is
    # raised explicitly to 48 MiB (above v5e's 16 MiB default).
    c_pad = ((C + 127) // 128) * 128
    vmem_budget = 24 * 1024 * 1024
    bytes_per_row = 4 * 2 * c_pad * 4
    max_rows = max(8, (vmem_budget // bytes_per_row) // 8 * 8)
    br = max(8, (min(int(block_rows), max_rows) // 8) * 8)
    if br > R:  # don't make the tile taller than the batch
        br = max(8, (R // 8) * 8)
    grid = pl.cdiv(R, br)

    kernel = functools.partial(_zinb_kernel,
                               ridge_lambda=float(ridge_lambda),
                               n_rows=R, block_rows=br)

    partials = pl.pallas_call(
        kernel,
        out_shape=jax.ShapeDtypeStruct((grid * 8, C), jnp.float32),
        grid_spec=pltpu.PrefetchScalarGridSpec(
            num_scalar_prefetch=0,
            grid=(grid,),
            in_specs=[pl.BlockSpec((br, C), lambda i: (i, 0))] * 4,
            out_specs=pl.BlockSpec((8, C), lambda i: (i, 0)),
        ),
        compiler_params=pltpu.CompilerParams(
            dimension_semantics=("parallel",),  # per-tile partials -> megacore-safe
            vmem_limit_bytes=48 * 1024 * 1024),
    )(x, mean, disp, pi)

    return jnp.sum(partials) / jnp.float32(R * C)


def zinb_loss_ref(x, mean, disp, pi, scale_factor=1.0, ridge_lambda=0.0):
    """Pure-JAX reference (mirrors the PyTorch forward)."""
    del scale_factor
    eps = 1e-10
    lg = jax.lax.lgamma
    t1 = lg(disp + eps) + lg(x + 1.0) - lg(x + disp + eps)
    t2 = (disp + x) * jnp.log(1.0 + mean / (disp + eps)) + \
         x * (jnp.log(disp + eps) - jnp.log(mean + eps))
    nb_case = t1 + t2 - jnp.log(1.0 - pi + eps)
    zero_nb = jnp.power(disp / (disp + mean + eps), disp)
    zero_case = -jnp.log(pi + (1.0 - pi) * zero_nb + eps)
    result = jnp.where(x <= 1e-08, zero_case, nb_case)
    if ridge_lambda > 0:
        result = result + ridge_lambda * jnp.square(pi)
    return jnp.mean(result)


if __name__ == "__main__":
    key = jax.random.PRNGKey(0)

    def make_inputs(k, B, G):
        k1, k2, k3, k4 = jax.random.split(k, 4)
        # x: non-negative counts (plenty of exact zeros -> exercises zero_case)
        x = jnp.floor(jax.random.uniform(k1, (B, G), jnp.float32, 0.0, 4.0))
        mean = jax.nn.softplus(jax.random.normal(k2, (B, G), jnp.float32)) + 0.1
        disp = jax.nn.softplus(jax.random.normal(k3, (B, G), jnp.float32)) + 0.1
        pi = jax.nn.sigmoid(jax.random.normal(k4, (B, G), jnp.float32))
        return x, mean, disp, pi

    # case 1: exact tiling, ridge on.  case 2: ragged batch (masking), ridge off.
    cases = [((16, 256), 0.5), ((20, 384), 0.0)]
    for idx, ((B, G), rl) in enumerate(cases):
        sub = jax.random.fold_in(key, idx)
        x, mean, disp, pi = make_inputs(sub, B, G)

        out = zinb_loss(x, mean, disp, pi, scale_factor=1.0, ridge_lambda=rl)
        out = jax.block_until_ready(out)
        ref = zinb_loss_ref(x, mean, disp, pi, scale_factor=1.0, ridge_lambda=rl)

        assert jnp.isfinite(out), f"case {idx}: non-finite loss"
        assert abs(float(out) - float(ref)) < 1e-3 * max(1.0, abs(float(ref))), \
            f"case {idx} mismatch: pallas={float(out)} ref={float(ref)}"

    print("KERNEL_OK")
</pallas_src>

<mosaic_0001>
module attributes {stable_mosaic.version = 11 : i64} {
  func.func @_zinb_kernel(%arg0: i32, %arg1: memref<16x256xf32, #tpu.memory_space<vmem>>, %arg2: memref<16x256xf32, #tpu.memory_space<vmem>>, %arg3: memref<16x256xf32, #tpu.memory_space<vmem>>, %arg4: memref<16x256xf32, #tpu.memory_space<vmem>>, %arg5: memref<8x256xf32, #tpu.memory_space<vmem>>) attributes {dimension_semantics = [#tpu.dimension_semantics<parallel>], iteration_bounds = array<i64: 1>, scalar_prefetch = 0 : i64, scratch_operands = 0 : i64, tpu.core_type = #tpu.core_type<tc>, window_params = [{transform_indices = @transform_0, window_bounds = array<i64: 16, 256>}, {transform_indices = @transform_1, window_bounds = array<i64: 16, 256>}, {transform_indices = @transform_2, window_bounds = array<i64: 16, 256>}, {transform_indices = @transform_3, window_bounds = array<i64: 16, 256>}, {transform_indices = @transform_4, window_bounds = array<i64: 8, 256>}]} {
    %c0 = arith.constant 0 : index
    %c0_0 = arith.constant 0 : index
    %0 = vector.load %arg1[%c0, %c0_0] : memref<16x256xf32, #tpu.memory_space<vmem>>, vector<16x256xf32>
    %c0_1 = arith.constant 0 : index
    %c0_2 = arith.constant 0 : index
    %1 = vector.load %arg2[%c0_1, %c0_2] : memref<16x256xf32, #tpu.memory_space<vmem>>, vector<16x256xf32>
    %c0_3 = arith.constant 0 : index
    %c0_4 = arith.constant 0 : index
    %2 = vector.load %arg3[%c0_3, %c0_4] : memref<16x256xf32, #tpu.memory_space<vmem>>, vector<16x256xf32>
    %c0_5 = arith.constant 0 : index
    %c0_6 = arith.constant 0 : index
    %3 = vector.load %arg4[%c0_5, %c0_6] : memref<16x256xf32, #tpu.memory_space<vmem>>, vector<16x256xf32>
    %cst = arith.constant 1.000000e-10 : f32
    %4 = vector.broadcast %cst : f32 to vector<16x256xf32>
    %5 = arith.addf %2, %4 : vector<16x256xf32>
    %6 = math.log %5 : vector<16x256xf32>
    %cst_7 = arith.constant 1.000000e-10 : f32
    %7 = vector.broadcast %cst_7 : f32 to vector<16x256xf32>
    %8 = arith.addf %1, %7 : vector<16x256xf32>
    %9 = math.log %8 : vector<16x256xf32>
    %10 = arith.addf %2, %1 : vector<16x256xf32>
    %cst_8 = arith.constant 1.000000e-10 : f32
    %11 = vector.broadcast %cst_8 : f32 to vector<16x256xf32>
    %12 = arith.addf %10, %11 : vector<16x256xf32>
    %13 = math.log %12 : vector<16x256xf32>
    %cst_9 = arith.constant 1.000000e-10 : f32
    %14 = vector.broadcast %cst_9 : f32 to vector<16x256xf32>
    %15 = arith.addf %2, %14 : vector<16x256xf32>
    %cst_10 = arith.constant 5.500000e+00 : f32
    %16 = vector.broadcast %cst_10 : f32 to vector<16x256xf32>
    %17 = arith.addf %15, %16 : vector<16x256xf32>
    %cst_11 = arith.constant 1.000000e+00 : f32
    %18 = vector.broadcast %cst_11 : f32 to vector<16x256xf32>
    %19 = arith.mulf %18, %15 : vector<16x256xf32>
    %cst_12 = arith.constant 33.4583321 : f32
    %20 = vector.broadcast %cst_12 : f32 to vector<16x256xf32>
    %21 = arith.addf %19, %20 : vector<16x256xf32>
    %22 = arith.mulf %21, %15 : vector<16x256xf32>
    %cst_13 = arith.constant 466.334198 : f32
    %23 = vector.broadcast %cst_13 : f32 to vector<16x256xf32>
    %24 = arith.addf %22, %23 : vector<16x256xf32>
    %25 = arith.mulf %24, %15 : vector<16x256xf32>
    %cst_14 = arith.constant 3465.70947 : f32
    %26 = vector.broadcast %cst_14 : f32 to vector<16x256xf32>
    %27 = arith.addf %25, %26 : vector<16x256xf32>
    %28 = arith.mulf %27, %15 : vector<16x256xf32>
    %cst_15 = arith.constant 14484.9141 : f32
    %29 = vector.broadcast %cst_15 : f32 to vector<16x256xf32>
    %30 = arith.addf %28, %29 : vector<16x256xf32>
    %31 = arith.mulf %30, %15 : vector<16x256xf32>
    %cst_16 = arith.constant 32281.0645 : f32
    %32 = vector.broadcast %cst_16 : f32 to vector<16x256xf32>
    %33 = arith.addf %31, %32 : vector<16x256xf32>
    %34 = arith.mulf %33, %15 : vector<16x256xf32>
    %cst_17 = arith.constant 29969.5938 : f32
    %35 = vector.broadcast %cst_17 : f32 to vector<16x256xf32>
    %36 = arith.addf %34, %35 : vector<16x256xf32>
    %cst_18 = arith.constant 1.000000e+00 : f32
    %37 = vector.broadcast %cst_18 : f32 to vector<16x256xf32>
    %38 = arith.mulf %37, %15 : vector<16x256xf32>
    %cst_19 = arith.constant 2.100000e+01 : f32
    %39 = vector.broadcast %cst_19 : f32 to vector<16x256xf32>
    %40 = arith.addf %38, %39 : vector<16x256xf32>
    %41 = arith.mulf %40, %15 : vector<16x256xf32>
    %cst_20 = arith.constant 1.750000e+02 : f32
    %42 = vector.broadcast %cst_20 : f32 to vector<16x256xf32>
    %43 = arith.addf %41, %42 : vector<16x256xf32>
    %44 = arith.mulf %43, %15 : vector<16x256xf32>
    %cst_21 = arith.constant 7.350000e+02 : f32
    %45 = vector.broadcast %cst_21 : f32 to vector<16x256xf32>
    %46 = arith.addf %44, %45 : vector<16x256xf32>
    %47 = arith.mulf %46, %15 : vector<16x256xf32>
    %cst_22 = arith.constant 1.624000e+03 : f32
    %48 = vector.broadcast %cst_22 : f32 to vector<16x256xf32>
    %49 = arith.addf %47, %48 : vector<16x256xf32>
    %50 = arith.mulf %49, %15 : vector<16x256xf32>
    %cst_23 = arith.constant 1.764000e+03 : f32
    %51 = vector.broadcast %cst_23 : f32 to vector<16x256xf32>
    %52 = arith.addf %50, %51 : vector<16x256xf32>
    %53 = arith.mulf %52, %15 : vector<16x256xf32>
    %cst_24 = arith.constant 7.200000e+02 : f32
    %54 = vector.broadcast %cst_24 : f32 to vector<16x256xf32>
    %55 = arith.addf %53, %54 : vector<16x256xf32>
    %cst_25 = arith.constant 5.000000e-01 : f32
    %56 = vector.broadcast %cst_25 : f32 to vector<16x256xf32>
    %57 = arith.addf %15, %56 : vector<16x256xf32>
    %58 = math.log %17 : vector<16x256xf32>
    %59 = arith.mulf %57, %58 : vector<16x256xf32>
    %60 = arith.subf %59, %17 : vector<16x256xf32>
    %cst_26 = arith.constant 2.50662827 : f32
    %61 = vector.broadcast %cst_26 : f32 to vector<16x256xf32>
    %62 = arith.mulf %61, %36 : vector<16x256xf32>
    %63 = math.log %62 : vector<16x256xf32>
    %64 = arith.addf %60, %63 : vector<16x256xf32>
    %65 = arith.mulf %55, %15 : vector<16x256xf32>
    %66 = math.log %65 : vector<16x256xf32>
    %67 = arith.subf %64, %66 : vector<16x256xf32>
    %cst_27 = arith.constant 1.000000e+00 : f32
    %68 = vector.broadcast %cst_27 : f32 to vector<16x256xf32>
    %69 = arith.addf %0, %68 : vector<16x256xf32>
    %cst_28 = arith.constant 5.500000e+00 : f32
    %70 = vector.broadcast %cst_28 : f32 to vector<16x256xf32>
    %71 = arith.addf %69, %70 : vector<16x256xf32>
    %cst_29 = arith.constant 1.000000e+00 : f32
    %72 = vector.broadcast %cst_29 : f32 to vector<16x256xf32>
    %73 = arith.mulf %72, %69 : vector<16x256xf32>
    %cst_30 = arith.constant 33.4583321 : f32
    %74 = vector.broadcast %cst_30 : f32 to vector<16x256xf32>
    %75 = arith.addf %73, %74 : vector<16x256xf32>
    %76 = arith.mulf %75, %69 : vector<16x256xf32>
    %cst_31 = arith.constant 466.334198 : f32
    %77 = vector.broadcast %cst_31 : f32 to vector<16x256xf32>
    %78 = arith.addf %76, %77 : vector<16x256xf32>
    %79 = arith.mulf %78, %69 : vector<16x256xf32>
    %cst_32 = arith.constant 3465.70947 : f32
    %80 = vector.broadcast %cst_32 : f32 to vector<16x256xf32>
    %81 = arith.addf %79, %80 : vector<16x256xf32>
    %82 = arith.mulf %81, %69 : vector<16x256xf32>
    %cst_33 = arith.constant 14484.9141 : f32
    %83 = vector.broadcast %cst_33 : f32 to vector<16x256xf32>
    %84 = arith.addf %82, %83 : vector<16x256xf32>
    %85 = arith.mulf %84, %69 : vector<16x256xf32>
    %cst_34 = arith.constant 32281.0645 : f32
    %86 = vector.broadcast %cst_34 : f32 to vector<16x256xf32>
    %87 = arith.addf %85, %86 : vector<16x256xf32>
    %88 = arith.mulf %87, %69 : vector<16x256xf32>
    %cst_35 = arith.constant 29969.5938 : f32
    %89 = vector.broadcast %cst_35 : f32 to vector<16x256xf32>
    %90 = arith.addf %88, %89 : vector<16x256xf32>
    %cst_36 = arith.constant 1.000000e+00 : f32
    %91 = vector.broadcast %cst_36 : f32 to vector<16x256xf32>
    %92 = arith.mulf %91, %69 : vector<16x256xf32>
    %cst_37 = arith.constant 2.100000e+01 : f32
    %93 = vector.broadcast %cst_37 : f32 to vector<16x256xf32>
    %94 = arith.addf %92, %93 : vector<16x256xf32>
    %95 = arith.mulf %94, %69 : vector<16x256xf32>
    %cst_38 = arith.constant 1.750000e+02 : f32
    %96 = vector.broadcast %cst_38 : f32 to vector<16x256xf32>
    %97 = arith.addf %95, %96 : vector<16x256xf32>
    %98 = arith.mulf %97, %69 : vector<16x256xf32>
    %cst_39 = arith.constant 7.350000e+02 : f32
    %99 = vector.broadcast %cst_39 : f32 to vector<16x256xf32>
    %100 = arith.addf %98, %99 : vector<16x256xf32>
    %101 = arith.mulf %100, %69 : vector<16x256xf32>
    %cst_40 = arith.constant 1.624000e+03 : f32
    %102 = vector.broadcast %cst_40 : f32 to vector<16x256xf32>
    %103 = arith.addf %101, %102 : vector<16x256xf32>
    %104 = arith.mulf %103, %69 : vector<16x256xf32>
    %cst_41 = arith.constant 1.764000e+03 : f32
    %105 = vector.broadcast %cst_41 : f32 to vector<16x256xf32>
    %106 = arith.addf %104, %105 : vector<16x256xf32>
    %107 = arith.mulf %106, %69 : vector<16x256xf32>
    %cst_42 = arith.constant 7.200000e+02 : f32
    %108 = vector.broadcast %cst_42 : f32 to vector<16x256xf32>
    %109 = arith.addf %107, %108 : vector<16x256xf32>
    %cst_43 = arith.constant 5.000000e-01 : f32
    %110 = vector.broadcast %cst_43 : f32 to vector<16x256xf32>
    %111 = arith.addf %69, %110 : vector<16x256xf32>
    %112 = math.log %71 : vector<16x256xf32>
    %113 = arith.mulf %111, %112 : vector<16x256xf32>
    %114 = arith.subf %113, %71 : vector<16x256xf32>
    %cst_44 = arith.constant 2.50662827 : f32
    %115 = vector.broadcast %cst_44 : f32 to vector<16x256xf32>
    %116 = arith.mulf %115, %90 : vector<16x256xf32>
    %117 = math.log %116 : vector<16x256xf32>
    %118 = arith.addf %114, %117 : vector<16x256xf32>
    %119 = arith.mulf %109, %69 : vector<16x256xf32>
    %120 = math.log %119 : vector<16x256xf32>
    %121 = arith.subf %118, %120 : vector<16x256xf32>
    %122 = arith.addf %67, %121 : vector<16x256xf32>
    %123 = arith.addf %0, %2 : vector<16x256xf32>
    %cst_45 = arith.constant 1.000000e-10 : f32
    %124 = vector.broadcast %cst_45 : f32 to vector<16x256xf32>
    %125 = arith.addf %123, %124 : vector<16x256xf32>
    %cst_46 = arith.constant 5.500000e+00 : f32
    %126 = vector.broadcast %cst_46 : f32 to vector<16x256xf32>
    %127 = arith.addf %125, %126 : vector<16x256xf32>
    %cst_47 = arith.constant 1.000000e+00 : f32
    %128 = vector.broadcast %cst_47 : f32 to vector<16x256xf32>
    %129 = arith.mulf %128, %125 : vector<16x256xf32>
    %cst_48 = arith.constant 33.4583321 : f32
    %130 = vector.broadcast %cst_48 : f32 to vector<16x256xf32>
    %131 = arith.addf %129, %130 : vector<16x256xf32>
    %132 = arith.mulf %131, %125 : vector<16x256xf32>
    %cst_49 = arith.constant 466.334198 : f32
    %133 = vector.broadcast %cst_49 : f32 to vector<16x256xf32>
    %134 = arith.addf %132, %133 : vector<16x256xf32>
    %135 = arith.mulf %134, %125 : vector<16x256xf32>
    %cst_50 = arith.constant 3465.70947 : f32
    %136 = vector.broadcast %cst_50 : f32 to vector<16x256xf32>
    %137 = arith.addf %135, %136 : vector<16x256xf32>
    %138 = arith.mulf %137, %125 : vector<16x256xf32>
    %cst_51 = arith.constant 14484.9141 : f32
    %139 = vector.broadcast %cst_51 : f32 to vector<16x256xf32>
    %140 = arith.addf %138, %139 : vector<16x256xf32>
    %141 = arith.mulf %140, %125 : vector<16x256xf32>
    %cst_52 = arith.constant 32281.0645 : f32
    %142 = vector.broadcast %cst_52 : f32 to vector<16x256xf32>
    %143 = arith.addf %141, %142 : vector<16x256xf32>
    %144 = arith.mulf %143, %125 : vector<16x256xf32>
    %cst_53 = arith.constant 29969.5938 : f32
    %145 = vector.broadcast %cst_53 : f32 to vector<16x256xf32>
    %146 = arith.addf %144, %145 : vector<16x256xf32>
    %cst_54 = arith.constant 1.000000e+00 : f32
    %147 = vector.broadcast %cst_54 : f32 to vector<16x256xf32>
    %148 = arith.mulf %147, %125 : vector<16x256xf32>
    %cst_55 = arith.constant 2.100000e+01 : f32
    %149 = vector.broadcast %cst_55 : f32 to vector<16x256xf32>
    %150 = arith.addf %148, %149 : vector<16x256xf32>
    %151 = arith.mulf %150, %125 : vector<16x256xf32>
    %cst_56 = arith.constant 1.750000e+02 : f32
    %152 = vector.broadcast %cst_56 : f32 to vector<16x256xf32>
    %153 = arith.addf %151, %152 : vector<16x256xf32>
    %154 = arith.mulf %153, %125 : vector<16x256xf32>
    %cst_57 = arith.constant 7.350000e+02 : f32
    %155 = vector.broadcast %cst_57 : f32 to vector<16x256xf32>
    %156 = arith.addf %154, %155 : vector<16x256xf32>
    %157 = arith.mulf %156, %125 : vector<16x256xf32>
    %cst_58 = arith.constant 1.624000e+03 : f32
    %158 = vector.broadcast %cst_58 : f32 to vector<16x256xf32>
    %159 = arith.addf %157, %158 : vector<16x256xf32>
    %160 = arith.mulf %159, %125 : vector<16x256xf32>
    %cst_59 = arith.constant 1.764000e+03 : f32
    %161 = vector.broadcast %cst_59 : f32 to vector<16x256xf32>
    %162 = arith.addf %160, %161 : vector<16x256xf32>
    %163 = arith.mulf %162, %125 : vector<16x256xf32>
    %cst_60 = arith.constant 7.200000e+02 : f32
    %164 = vector.broadcast %cst_60 : f32 to vector<16x256xf32>
    %165 = arith.addf %163, %164 : vector<16x256xf32>
    %cst_61 = arith.constant 5.000000e-01 : f32
    %166 = vector.broadcast %cst_61 : f32 to vector<16x256xf32>
    %167 = arith.addf %125, %166 : vector<16x256xf32>
    %168 = math.log %127 : vector<16x256xf32>
    %169 = arith.mulf %167, %168 : vector<16x256xf32>
    %170 = arith.subf %169, %127 : vector<16x256xf32>
    %cst_62 = arith.constant 2.50662827 : f32
    %171 = vector.broadcast %cst_62 : f32 to vector<16x256xf32>
    %172 = arith.mulf %171, %146 : vector<16x256xf32>
    %173 = math.log %172 : vector<16x256xf32>
    %174 = arith.addf %170, %173 : vector<16x256xf32>
    %175 = arith.mulf %165, %125 : vector<16x256xf32>
    %176 = math.log %175 : vector<16x256xf32>
    %177 = arith.subf %174, %176 : vector<16x256xf32>
    %178 = arith.subf %122, %177 : vector<16x256xf32>
    %179 = arith.addf %2, %0 : vector<16x256xf32>
    %180 = arith.subf %13, %6 : vector<16x256xf32>
    %181 = arith.mulf %179, %180 : vector<16x256xf32>
    %182 = arith.subf %6, %9 : vector<16x256xf32>
    %183 = arith.mulf %0, %182 : vector<16x256xf32>
    %184 = arith.addf %181, %183 : vector<16x256xf32>
    %185 = arith.addf %178, %184 : vector<16x256xf32>
    %cst_63 = arith.constant 1.000000e+00 : f32
    %186 = vector.broadcast %cst_63 : f32 to vector<16x256xf32>
    %187 = arith.subf %186, %3 : vector<16x256xf32>
    %cst_64 = arith.constant 1.000000e-10 : f32
    %188 = vector.broadcast %cst_64 : f32 to vector<16x256xf32>
    %189 = arith.addf %187, %188 : vector<16x256xf32>
    %190 = math.log %189 : vector<16x256xf32>
    %191 = arith.subf %185, %190 : vector<16x256xf32>
    %192 = arith.subf %6, %13 : vector<16x256xf32>
    %193 = arith.mulf %2, %192 : vector<16x256xf32>
    %194 = math.exp %193 : vector<16x256xf32>
    %cst_65 = arith.constant 1.000000e+00 : f32
    %195 = vector.broadcast %cst_65 : f32 to vector<16x256xf32>
    %196 = arith.subf %195, %3 : vector<16x256xf32>
    %197 = arith.mulf %196, %194 : vector<16x256xf32>
    %198 = arith.addf %3, %197 : vector<16x256xf32>
    %cst_66 = arith.constant 1.000000e-10 : f32
    %199 = vector.broadcast %cst_66 : f32 to vector<16x256xf32>
    %200 = arith.addf %198, %199 : vector<16x256xf32>
    %201 = math.log %200 : vector<16x256xf32>
    %cst_67 = arith.constant 0.000000e+00 : f32
    %202 = vector.broadcast %cst_67 : f32 to vector<16x256xf32>
    %203 = arith.subf %202, %201 : vector<16x256xf32>
    %cst_68 = arith.constant 9.99999993E-9 : f32
    %204 = vector.broadcast %cst_68 : f32 to vector<16x256xf32>
    %205 = arith.cmpf ole, %0, %204 : vector<16x256xf32>
    %206 = arith.select %205, %203, %191 : vector<16x256xi1>, vector<16x256xf32>
    %207 = arith.mulf %3, %3 : vector<16x256xf32>
    %cst_69 = arith.constant 5.000000e-01 : f32
    %208 = vector.broadcast %cst_69 : f32 to vector<16x256xf32>
    %209 = arith.mulf %208, %207 : vector<16x256xf32>
    %210 = arith.addf %206, %209 : vector<16x256xf32>
    %211 = tpu.iota {dimensions = array<i32: 0>} : vector<16x256xi32>
    %c16_i32 = arith.constant 16 : i32
    %212 = arith.muli %arg0, %c16_i32 : i32
    %213 = vector.broadcast %212 : i32 to vector<16x256xi32>
    %214 = arith.addi %211, %213 : vector<16x256xi32>
    %c16_i32_70 = arith.constant 16 : i32
    %215 = vector.broadcast %c16_i32_70 : i32 to vector<16x256xi32>
    %216 = arith.cmpi slt, %214, %215 : vector<16x256xi32>
    %cst_71 = arith.constant 0.000000e+00 : f32
    %217 = vector.broadcast %cst_71 : f32 to vector<16x256xf32>
    %218 = arith.select %216, %210, %217 : vector<16x256xi1>, vector<16x256xf32>
    %219 = vector.shape_cast %218 : vector<16x256xf32> to vector<2x8x256xf32>
    %cst_72 = arith.constant dense<0.000000e+00> : vector<8x256xf32>
    %220 = vector.multi_reduction <add>, %219, %cst_72 [0] : vector<2x8x256xf32> to vector<8x256xf32>
    %c0_73 = arith.constant 0 : index
    %c0_74 = arith.constant 0 : index
    %221 = vector.load %arg5[%c0_73, %c0_74] : memref<8x256xf32, #tpu.memory_space<vmem>>, vector<8x256xf32>
    tpu.vector_store %arg5[%c0_73, %c0_74], %220 {strides = array<i32>} : memref<8x256xf32, #tpu.memory_space<vmem>>, vector<8x256xf32>,
    return
  }
  func.func @transform_0(%arg0: i32) -> (i32, i32) {
    %c0_i32 = arith.constant 0 : i32
    %c0_i32_0 = arith.constant 0 : i32
    return %arg0, %c0_i32 : i32, i32
  }
  func.func @transform_1(%arg0: i32) -> (i32, i32) {
    %c0_i32 = arith.constant 0 : i32
    %c0_i32_0 = arith.constant 0 : i32
    return %arg0, %c0_i32 : i32, i32
  }
  func.func @transform_2(%arg0: i32) -> (i32, i32) {
    %c0_i32 = arith.constant 0 : i32
    %c0_i32_0 = arith.constant 0 : i32
    return %arg0, %c0_i32 : i32, i32
  }
  func.func @transform_3(%arg0: i32) -> (i32, i32) {
    %c0_i32 = arith.constant 0 : i32
    %c0_i32_0 = arith.constant 0 : i32
    return %arg0, %c0_i32 : i32, i32
  }
  func.func @transform_4(%arg0: i32) -> (i32, i32) {
    %c0_i32 = arith.constant 0 : i32
    %c0_i32_0 = arith.constant 0 : i32
    return %arg0, %c0_i32 : i32, i32
  }
}

</mosaic_0001>

<bundles_post_ra>
// kernel: tpu_custom_call.1
= control target key start
LH: loop header
LB: loop body
LE: loop exit
PB: predicated region body
PF: predicated region fallthrough
CT: control target
= control target key end

     0   :  { %9 = vsyncpa [#allocation3], 0  ;;  %s1578_s0 = inlined_call_operand.hbm [shape: f32[16,256], index: 0, kind: input, shape index: {}]   ;;  %s1579_s1 = inlined_call_operand.hbm [shape: f32[16,256], index: 1, kind: input, shape index: {}]   ;;  %s1580_s2 = inlined_call_operand.hbm [shape: f32[16,256], index: 2, kind: input, shape index: {}]   ;;  %s1581_s3 = inlined_call_operand.hbm [shape: f32[16,256], index: 3, kind: input, shape index: {}]   ;;  %s1582_s4 = inlined_call_operand.hbm [shape: f32[8,256], index: 4, kind: output, shape index: {}]  }
   0x1   :  { %10 = vsyncpa [#allocation6], 0 }
   0x2   :  { %11 = vsyncpa [#allocation9], 0 }
   0x3   :  { %12 = vsyncpa [#allocation4], 0  ;;  %s968_s15 = smov [#allocation5]   ;;  %s969_s17 = smov [#allocation2]  }
   0x4   :  { %s30_s16 = sshll.u32 %s968_s15, 4  ;;  %s18_s18 = sshll.u32 %s969_s17, 4  ;;  %s31_s16 = int_to_ptr.vmem [resolvable:$true] %s30_s16  ;;  %s1000_s18 = int_to_ptr.vmem [resolvable:$true] %s18_s18 }
   0x5   :  { %s850_s21 = scalar_lea.hbm %s1579_s1, 512 }
   0x6   :  { %p851_p0 = scmp.ne.s32.totalorder %s1579_s1, %s850_s21  ;;  %p854_p1 = scmp.lt.u32.totalorder %s850_s21, %s1579_s1 }
   0x8   :  { %p856_p2 = pnand %p854_p1, %p851_p0 }
   0xa   :  { %859 = shalt.err (!%p856_p2)
}
   0xb   :  { %s860_s26 = scalar_lea.vmem %s31_s16, 512  ;;  %p865_p4 = scmp.lt.s32.totalorder %s31_s16, %s31_s16 }
   0xc   :  { %p861_p3 = scmp.ne.s32.totalorder %s31_s16, %s860_s26  ;;  %p866_p5 = scmp.lt.s32.totalorder %s860_s26, %s860_s26 }
   0xe   :  { %p867_p6 = por %p866_p5, %p865_p4 }
  0x10   :  { %p868_p7 = pnand %p867_p6, %p861_p3 }
  0x12   :  { %871 = shalt.err (!%p868_p7)
}
  0x13   :  { %s970_s27 = smov 256   ;;  %s971_s28 = smov 16  }
  0x14   :  { %36 = dma.hbm_to_vmem [thread:$0]  %s1579_s1, 512, %s31_s16, [#allocation6], %s970_s27, %s970_s27, %s971_s28  }
  0x15   :  { %s872_s7 = scalar_lea.hbm %s1578_s0, 512 }
  0x16   :  { %p873_p8 = scmp.ne.s32.totalorder %s1578_s0, %s872_s7  ;;  %p876_p9 = scmp.lt.u32.totalorder %s872_s7, %s1578_s0 }
  0x18   :  { %p878_p10 = pnand %p876_p9, %p873_p8 }
  0x1a   :  { %881 = shalt.err (!%p878_p10)
}
  0x1b   :  { %s882_s12 = scalar_lea.vmem %s1000_s18, 512  ;;  %p887_p12 = scmp.lt.s32.totalorder %s1000_s18, %s1000_s18 }
  0x1c   :  { %p883_p11 = scmp.ne.s32.totalorder %s1000_s18, %s882_s12  ;;  %p888_p13 = scmp.lt.s32.totalorder %s882_s12, %s882_s12 }
  0x1e   :  { %p889_p0 = por %p888_p13, %p887_p12 }
  0x20   :  { %p890_p1 = pnand %p889_p0, %p883_p11 }
  0x22   :  { %893 = shalt.err (!%p890_p1)
}
  0x23   :  { %24 = dma.hbm_to_vmem [thread:$0]  %s1578_s0, 512, %s1000_s18, [#allocation3], %s970_s27, %s970_s27, %s971_s28  }
  0x24   :  { %s972_s14 = smov [#allocation7]   ;;  %s973_s16 = smov [#allocation8]  }
  0x25   :  { %s42_s15 = sshll.u32 %s972_s14, 4  ;;  %s54_s17 = sshll.u32 %s973_s16, 4  ;;  %s43_s15 = int_to_ptr.vmem [resolvable:$true] %s42_s15  ;;  %s1037_s17 = int_to_ptr.vmem [resolvable:$true] %s54_s17 }
  0x26   :  { %s894_s21 = scalar_lea.hbm %s1580_s2, 512 }
  0x27   :  { %p895_p2 = scmp.ne.s32.totalorder %s1580_s2, %s894_s21  ;;  %p898_p3 = scmp.lt.u32.totalorder %s894_s21, %s1580_s2 }
  0x29   :  { %p900_p4 = pnand %p898_p3, %p895_p2 }
  0x2b   :  { %903 = shalt.err (!%p900_p4)
}
  0x2c   :  { %s904_s0 = scalar_lea.vmem %s43_s15, 512  ;;  %p909_p6 = scmp.lt.s32.totalorder %s43_s15, %s43_s15 }
  0x2d   :  { %p905_p5 = scmp.ne.s32.totalorder %s43_s15, %s904_s0  ;;  %p910_p7 = scmp.lt.s32.totalorder %s904_s0, %s904_s0 }
  0x2f   :  { %p911_p8 = por %p910_p7, %p909_p6 }
  0x31   :  { %p912_p9 = pnand %p911_p8, %p905_p5 }
  0x33   :  { %915 = shalt.err (!%p912_p9)
}
  0x34   :  { %48 = dma.hbm_to_vmem [thread:$0]  %s1580_s2, 512, %s43_s15, [#allocation6], %s970_s27, %s970_s27, %s971_s28  }
  0x35   :  { %s916_s5 = scalar_lea.hbm %s1581_s3, 512 }
  0x36   :  { %p917_p10 = scmp.ne.s32.totalorder %s1581_s3, %s916_s5  ;;  %p920_p11 = scmp.lt.u32.totalorder %s916_s5, %s1581_s3 }
  0x38   :  { %p922_p12 = pnand %p920_p11, %p917_p10 }
  0x3a   :  { %925 = shalt.err (!%p922_p12)
}
  0x3b   :  { %s926_s10 = scalar_lea.vmem %s1037_s17, 512  ;;  %p931_p0 = scmp.lt.s32.totalorder %s1037_s17, %s1037_s17 }
  0x3c   :  { %p927_p13 = scmp.ne.s32.totalorder %s1037_s17, %s926_s10  ;;  %p932_p1 = scmp.lt.s32.totalorder %s926_s10, %s926_s10 }
  0x3e   :  { %p933_p2 = por %p932_p1, %p931_p0 }
  0x40   :  { %p934_p3 = pnand %p933_p2, %p927_p13 }
  0x42   :  { %937 = shalt.err (!%p934_p3)
}
  0x43   :  { %60 = dma.hbm_to_vmem [thread:$0]  %s1581_s3, 512, %s1037_s17, [#allocation9], %s970_s27, %s970_s27, %s971_s28  }
  0x44   :  { %960 = dma.done.wait [#allocation3], 512  }
  0x45   :  { %961 = vsyncadd [#allocation3], 4294966784 }
  0x46   :  { %962 = dma.done.wait [#allocation6], 1024  }
  0x47   :  { %963 = vsyncadd [#allocation6], 4294966272 }
  0x48   :  { %964 = dma.done.wait [#allocation9], 512  }
  0x49   :  { %965 = vsyncadd [#allocation9], 4294966784  ;;  %v1074_v0 = vld [vmem:[#allocation7] sm:$0xff]  ;;  %v1076_v1 = vld [vmem:[#allocation7 + $0x8] sm:$0xff]  ;;  %s974_s3 = smov [#allocation10]  }
  0x4a   :  { %v1078_v2 = vld [vmem:[#allocation7 + $0x10] sm:$0xff]  ;;  %v1080_v3 = vld [vmem:[#allocation7 + $0x18] sm:$0xff]  ;;  %v1083_v4 = vadd.f32 1e-10, %v1074_v0  ;;  %v1086_v5 = vadd.f32 1e-10, %v1076_v1 }
  0x4b   :  { %v1089_v6 = vadd.f32 1e-10, %v1078_v2  ;;  %v1092_v7 = vadd.f32 1e-10, %v1080_v3  ;;  %v1114_v38 = vld [vmem:[#allocation2] sm:$0xff]  ;;  %v1117_v42 = vld [vmem:[#allocation2 + $0x8] sm:$0xff] }
  0x4c   :  { %v133_v8 = vadd.f32 33.458332, %v1083_v4  ;;  %v134_v9 = vadd.f32 33.458332, %v1086_v5  ;;  %v177_v16 = vadd.f32 21.0, %v1083_v4  ;;  %v178_v18 = vadd.f32 21.0, %v1086_v5 }
  0x4d   :  { %v135_v10 = vadd.f32 33.458332, %v1089_v6  ;;  %v136_v11 = vadd.f32 33.458332, %v1092_v7  ;;  %v179_v20 = vadd.f32 21.0, %v1089_v6  ;;  %v180_v23 = vadd.f32 21.0, %v1092_v7 }
  0x4e   :  { %v137_v12 = vmul.f32 %v133_v8, %v1083_v4  ;;  %v138_v13 = vmul.f32 %v134_v9, %v1086_v5  ;;  %v181_v24 = vmul.f32 %v177_v16, %v1083_v4  ;;  %v182_v26 = vmul.f32 %v178_v18, %v1086_v5  ;;  %v1121_v45 = vld [vmem:[#allocation2 + $0x10] sm:$0xff]  ;;  %v1123_v46 = vld [vmem:[#allocation2 + $0x18] sm:$0xff]  ;;  %v77_v47 = vld [vmem:[#allocation5] sm:$0xff]  ;;  %s708_s27 = sshll.u32 %s974_s3, 4  ;;  %s709_s27 = int_to_ptr.vmem [resolvable:$true] %s708_s27 }
  0x4f   :  { %v139_v14 = vmul.f32 %v135_v10, %v1089_v6  ;;  %v140_v15 = vmul.f32 %v136_v11, %v1092_v7  ;;  %v183_v28 = vmul.f32 %v179_v20, %v1089_v6  ;;  %v184_v31 = vmul.f32 %v180_v23, %v1092_v7  ;;  %v78_v53 = vld [vmem:[#allocation5 + $0x8] sm:$0xff]  ;;  %v79_v54 = vld [vmem:[#allocation5 + $0x10] sm:$0xff]  ;;  %v80_v63 = vld [vmem:[#allocation5 + $0x18] sm:$0xff]  ;;  %s938_s28 = scalar_lea.vmem %s709_s27, 256  ;;  %p943_p5 = scmp.lt.s32.totalorder %s709_s27, %s709_s27 }
  0x50   :  { %v141_v17 = vadd.f32 466.3342, %v137_v12  ;;  %v142_v19 = vadd.f32 466.3342, %v138_v13  ;;  %v185_v32 = vadd.f32 175.0, %v181_v24  ;;  %v186_v34 = vadd.f32 175.0, %v182_v26  ;;  %p939_p4 = scmp.ne.s32.totalorder %s709_s27, %s938_s28  ;;  %p944_p6 = scmp.lt.s32.totalorder %s938_s28, %s938_s28 }
  0x51   :  { %v143_v21 = vadd.f32 466.3342, %v139_v14  ;;  %v144_v22 = vadd.f32 466.3342, %v140_v15  ;;  %v187_v36 = vadd.f32 175.0, %v183_v28  ;;  %v188_v40 = vadd.f32 175.0, %v184_v31 }
  0x52   :  { %v145_v25 = vmul.f32 %v141_v17, %v1083_v4  ;;  %v146_v27 = vmul.f32 %v142_v19, %v1086_v5  ;;  %v189_v41 = vmul.f32 %v185_v32, %v1083_v4  ;;  %v190_v44 = vmul.f32 %v186_v34, %v1086_v5  ;;  %p945_p7 = por %p944_p6, %p943_p5 }
  0x53   :  { %v147_v29 = vmul.f32 %v143_v21, %v1089_v6  ;;  %v148_v30 = vmul.f32 %v144_v22, %v1092_v7  ;;  %v191_v49 = vmul.f32 %v187_v36, %v1089_v6  ;;  %v101_v50 = vadd.f32 1e-10, %v77_v47 }
  0x54   :  { %v149_v33 = vadd.f32 3465.7095, %v145_v25  ;;  %v150_v35 = vadd.f32 3465.7095, %v146_v27  ;;  %v1129_v52 = vadd.f32 1.0, %v1114_v38  ;;  %v192_v56 = vmul.f32 %v188_v40, %v1092_v7  ;;  %p946_p8 = pnand %p945_p7, %p939_p4 }
  0x55   :  { %v151_v37 = vadd.f32 3465.7095, %v147_v29  ;;  %v152_v39 = vadd.f32 3465.7095, %v148_v30  ;;  %v193_v57 = vadd.f32 735.0, %v189_v41  ;;  %v1134_v58 = vadd.f32 1.0, %v1117_v42 }
  0x56   :  { %v153_v43 = vmul.f32 %v149_v33, %v1083_v4  ;;  %v154_v48 = vmul.f32 %v150_v35, %v1086_v5  ;;  %v194_v60 = vadd.f32 735.0, %v190_v44  ;;  %v1137_v61 = vadd.f32 1.0, %v1121_v45 }
  0x57   :  { %v155_v51 = vmul.f32 %v151_v37, %v1089_v6  ;;  %v156_v55 = vmul.f32 %v152_v39, %v1092_v7  ;;  %v1140_v62 = vadd.f32 1.0, %v1123_v46  ;;  %v113_v8 = vadd.f32 %v1074_v0, %v77_v47 }
  0x58   :  { %v157_v59 = vadd.f32 14484.914, %v153_v43  ;;  %v158_v9 = vadd.f32 14484.914, %v154_v48  ;;  %v195_v10 = vadd.f32 735.0, %v191_v49  ;;  %v1144_v11 = vadd.f32 5.5, %v1129_v52 }
  0x59   :  { %726 = vlog2.f32 %v101_v50  ;;  %v114_v12 = vadd.f32 %v1076_v1, %v78_v53  ;;  %v115_v13 = vadd.f32 %v1078_v2, %v79_v54  ;;  %v159_v14 = vadd.f32 14484.914, %v155_v51 }
  0x5a   :  { %728 = vlog2.f32 %v1083_v4  ;;  %v160_v15 = vadd.f32 14484.914, %v156_v55  ;;  %v196_v16 = vadd.f32 735.0, %v192_v56  ;;  %v197_v17 = vmul.f32 %v193_v57, %v1083_v4 }
  0x5b   :  { %730 = vlog2.f32 %v1086_v5  ;;  %v116_v18 = vadd.f32 %v1080_v3, %v80_v63  ;;  %v161_v19 = vmul.f32 %v157_v59, %v1083_v4  ;;  %v198_v20 = vmul.f32 %v194_v60, %v1086_v5 }
  0x5c   :  { %v102_v21 = vadd.f32 1e-10, %v78_v53  ;;  %v103_v22 = vadd.f32 1e-10, %v79_v54  ;;  %v162_v23 = vmul.f32 %v158_v9, %v1086_v5  ;;  %v199_v24 = vmul.f32 %v195_v10, %v1089_v6 }
  0x5d   :  { %732 = vlog2.f32 %v1089_v6  ;;  %v104_v25 = vadd.f32 1e-10, %v80_v63  ;;  %v117_v26 = vadd.f32 1e-10, %v113_v8  ;;  %v163_v27 = vmul.f32 %v159_v14, %v1089_v6 }
  0x5e   :  { %v118_v28 = vadd.f32 1e-10, %v114_v12  ;;  %v164_v29 = vmul.f32 %v160_v15, %v1092_v7  ;;  %v200_v30 = vmul.f32 %v196_v16, %v1092_v7  ;;  %v201_v31 = vadd.f32 1624.0, %v197_v17 }
  0x5f   :  { %734 = vlog2.f32 %v1092_v7  ;;  %v119_v32 = vadd.f32 1e-10, %v115_v13  ;;  %v165_v33 = vadd.f32 32281.064, %v161_v19  ;;  %v202_v34 = vadd.f32 1624.0, %v198_v20 }
  0x60   :  { %736 = vlog2.f32 %v102_v21  ;;  %v120_v35 = vadd.f32 1e-10, %v116_v18  ;;  %v166_v36 = vadd.f32 32281.064, %v162_v23  ;;  %v203_v37 = vadd.f32 1624.0, %v199_v24 }
  0x61   :  { %738 = vlog2.f32 %v103_v22  ;;  %v1162_v39 = vadd.f32 5.5, %v1083_v4  ;;  %v1165_v40 = vadd.f32 5.5, %v1086_v5  ;;  %v167_v41 = vadd.f32 32281.064, %v163_v27 }
  0x62   :  { %740 = vlog2.f32 %v104_v25  ;;  %v168_v43 = vadd.f32 32281.064, %v164_v29  ;;  %v204_v44 = vadd.f32 1624.0, %v200_v30  ;;  %v205_v47 = vmul.f32 %v201_v31, %v1083_v4 }
  0x63   :  { %v727_v48 = vpop.eup %726  ;;  %742 = vlog2.f32 %v117_v26  ;;  %v1169_v49 = vadd.f32 5.5, %v1089_v6  ;;  %v169_v50 = vmul.f32 %v165_v33, %v1083_v4  ;;  %v206_v51 = vmul.f32 %v202_v34, %v1086_v5 }
  0x64   :  { %v729_v53 = vpop.eup %728  ;;  %744 = vlog2.f32 %v118_v28  ;;  %v1174_v54 = vadd.f32 5.5, %v1092_v7  ;;  %v170_v55 = vmul.f32 %v166_v36, %v1086_v5  ;;  %v207_v56 = vmul.f32 %v203_v37, %v1089_v6 }
  0x65   :  { %v731_v57 = vpop.eup %730  ;;  %746 = vlog2.f32 %v119_v32  ;;  %v171_v59 = vmul.f32 %v167_v41, %v1089_v6  ;;  %v281_v60 = vadd.f32 33.458332, %v1129_v52  ;;  %v282_v63 = vadd.f32 33.458332, %v1134_v58 }
  0x66   :  { %v1181_v8 = vmul.f32 0.6931472, %v727_v48  ;;  %v172_v9 = vmul.f32 %v168_v43, %v1092_v7  ;;  %v208_v10 = vmul.f32 %v204_v44, %v1092_v7  ;;  %v209_v12 = vadd.f32 1764.0, %v205_v47 }
  0x67   :  { %v733_v13 = vpop.eup %732  ;;  %v173_v14 = vadd.f32 29969.594, %v169_v50  ;;  %v210_v15 = vadd.f32 1764.0, %v206_v51  ;;  %748 = vlog2.f32 %v1162_v39  ;;  %v283_v16 = vadd.f32 33.458332, %v1137_v61 }
  0x68   :  { %1590 = vst [vmem:[#allocation15_spill] sm:$0xff] %v1181_v8  ;;  %v174_v17 = vadd.f32 29969.594, %v170_v55  ;;  %v211_v18 = vadd.f32 1764.0, %v207_v56  ;;  %750 = vlog2.f32 %v1165_v40  ;;  %v284_v19 = vadd.f32 33.458332, %v1140_v62 }
  0x69   :  { %v735_v20 = vpop.eup %734  ;;  %v175_v21 = vadd.f32 29969.594, %v171_v59  ;;  %752 = vlog2.f32 %v1169_v49  ;;  %v285_v22 = vmul.f32 %v281_v60, %v1129_v52  ;;  %v286_v23 = vmul.f32 %v282_v63, %v1134_v58 }
  0x6a   :  { %v737_v24 = vpop.eup %736  ;;  %v176_v25 = vadd.f32 29969.594, %v172_v9  ;;  %v212_v26 = vadd.f32 1764.0, %v208_v10  ;;  %v213_v27 = vmul.f32 %v209_v12, %v1083_v4  ;;  %754 = vlog2.f32 %v1174_v54 }
  0x6b   :  { %v739_v28 = vpop.eup %738  ;;  %v1194_v29 = vmul.f32 0.6931472, %v729_v53  ;;  %v214_v30 = vmul.f32 %v210_v15, %v1086_v5  ;;  %v241_v31 = vmul.f32 2.5066283, %v173_v14  ;;  %v287_v32 = vmul.f32 %v283_v16, %v1137_v61 }
  0x6c   :  { %v741_v33 = vpop.eup %740  ;;  %v1198_v34 = vmul.f32 0.6931472, %v731_v57  ;;  %v215_v36 = vmul.f32 %v211_v18, %v1089_v6  ;;  %v242_v37 = vmul.f32 2.5066283, %v174_v17  ;;  %v288_v41 = vmul.f32 %v284_v19, %v1140_v62 }
  0x6d   :  { %v743_v43 = vpop.eup %742  ;;  %756 = vlog2.f32 %v120_v35  ;;  %v243_v44 = vmul.f32 2.5066283, %v175_v21  ;;  %v289_v47 = vadd.f32 466.3342, %v285_v22  ;;  %v290_v48 = vadd.f32 466.3342, %v286_v23 }
  0x6e   :  { %v745_v50 = vpop.eup %744  ;;  %v1202_v51 = vmul.f32 0.6931472, %v733_v13  ;;  %v216_v53 = vmul.f32 %v212_v26, %v1092_v7  ;;  %v217_v55 = vadd.f32 720.0, %v213_v27  ;;  %v244_v56 = vmul.f32 2.5066283, %v176_v25 }
  0x6f   :  { %v747_v59 = vpop.eup %746  ;;  %v1205_v57 = vmul.f32 0.6931472, %v735_v20  ;;  %v218_v60 = vadd.f32 720.0, %v214_v30  ;;  %758 = vlog2.f32 %v241_v31  ;;  %v291_v63 = vadd.f32 466.3342, %v287_v32 }
  0x70   :  { %v1207_v9 = vmul.f32 0.6931472, %v737_v24  ;;  %v219_v10 = vadd.f32 720.0, %v215_v36  ;;  %760 = vlog2.f32 %v242_v37  ;;  %v292_v35 = vadd.f32 466.3342, %v288_v41 }
  0x71   :  { %v749_v12 = vpop.eup %748  ;;  %v1209_v14 = vmul.f32 0.6931472, %v739_v28  ;;  %762 = vlog2.f32 %v243_v44  ;;  %v293_v13 = vmul.f32 %v289_v47, %v1129_v52  ;;  %v294_v15 = vmul.f32 %v290_v48, %v1134_v58 }
  0x72   :  { %1591 = vst [vmem:[#allocation16_spill] sm:$0xff] %v1207_v9  ;;  %v751_v16 = vpop.eup %750  ;;  %v1213_v17 = vmul.f32 0.6931472, %v741_v33  ;;  %v220_v18 = vadd.f32 720.0, %v216_v53  ;;  %764 = vlog2.f32 %v244_v56  ;;  %v257_v19 = vmul.f32 %v217_v55, %v1083_v4 }
  0x73   :  { %1592 = vst [vmem:[#allocation17_spill] sm:$0xff] %v1209_v14  ;;  %v753_v20 = vpop.eup %752  ;;  %v1216_v21 = vmul.f32 0.6931472, %v743_v43  ;;  %v221_v22 = vadd.f32 0.5, %v1083_v4  ;;  %v258_v23 = vmul.f32 %v218_v60, %v1086_v5  ;;  %v295_v24 = vmul.f32 %v291_v63, %v1137_v61 }
  0x74   :  { %1593 = vst [vmem:[#allocation18_spill] sm:$0xff] %v1213_v17  ;;  %v755_v25 = vpop.eup %754  ;;  %v222_v26 = vadd.f32 0.5, %v1086_v5  ;;  %v226_v27 = vmul.f32 0.6931472, %v749_v12  ;;  %v259_v28 = vmul.f32 %v219_v10, %v1089_v6  ;;  %v296_v30 = vmul.f32 %v292_v35, %v1140_v62 }
  0x75   :  { %v228_v31 = vmul.f32 0.6931472, %v751_v16  ;;  %v297_v32 = vadd.f32 3465.7095, %v293_v13  ;;  %v298_v33 = vadd.f32 3465.7095, %v294_v15  ;;  %v260_v4 = vmul.f32 %v220_v18, %v1092_v7 }
  0x76   :  { %v223_v36 = vadd.f32 0.5, %v1089_v6  ;;  %v230_v37 = vmul.f32 0.6931472, %v753_v20  ;;  %766 = vlog2.f32 %v257_v19  ;;  %v224_v43 = vadd.f32 0.5, %v1092_v7 }
  0x77   :  { %v757_v41 = vpop.eup %756  ;;  %v232_v44 = vmul.f32 0.6931472, %v755_v25  ;;  %768 = vlog2.f32 %v258_v23  ;;  %v299_v5 = vadd.f32 3465.7095, %v295_v24  ;;  %v233_v47 = vmul.f32 %v226_v27, %v221_v22 }
  0x78   :  { %770 = vlog2.f32 %v259_v28  ;;  %v300_v48 = vadd.f32 3465.7095, %v296_v30  ;;  %v325_v53 = vadd.f32 21.0, %v1129_v52  ;;  %v234_v56 = vmul.f32 %v228_v31, %v222_v26 }
  0x79   :  { %v759_v55 = vpop.eup %758  ;;  %v301_v60 = vmul.f32 %v297_v32, %v1129_v52  ;;  %v302_v6 = vmul.f32 %v298_v33, %v1134_v58  ;;  %v326_v63 = vadd.f32 21.0, %v1134_v58  ;;  %v1231_v35 = vmul.f32 0.6931472, %v745_v50 }
  0x7a   :  { %v761_v10 = vpop.eup %760  ;;  %v235_v7 = vmul.f32 %v230_v37, %v223_v36  ;;  %772 = vlog2.f32 %v260_v4  ;;  %v327_v12 = vadd.f32 21.0, %v1137_v61  ;;  %v1234_v15 = vmul.f32 0.6931472, %v747_v59 }
  0x7b   :  { %v763_v13 = vpop.eup %762  ;;  %v236_v16 = vmul.f32 %v232_v44, %v224_v43  ;;  %v303_v18 = vmul.f32 %v299_v5, %v1137_v61  ;;  %v328_v19 = vadd.f32 21.0, %v1140_v62  ;;  %v237_v22 = vsub.f32 %v233_v47, %v1162_v39 }
  0x7c   :  { %v765_v20 = vpop.eup %764  ;;  %v246_v23 = vmul.f32 0.6931472, %v759_v55  ;;  %v304_v24 = vmul.f32 %v300_v48, %v1140_v62  ;;  %v329_v50 = vmul.f32 %v325_v53, %v1129_v52  ;;  %v238_v25 = vsub.f32 %v234_v56, %v1165_v40 }
  0x7d   :  { %v305_v26 = vadd.f32 14484.914, %v301_v60  ;;  %v306_v27 = vadd.f32 14484.914, %v302_v6  ;;  %v330_v59 = vmul.f32 %v326_v63, %v1134_v58  ;;  %v239_v28 = vsub.f32 %v235_v7, %v1169_v49 }
  0x7e   :  { %v248_v30 = vmul.f32 0.6931472, %v761_v10  ;;  %v250_v31 = vmul.f32 0.6931472, %v763_v13  ;;  %v331_v32 = vmul.f32 %v327_v12, %v1137_v61  ;;  %v240_v33 = vsub.f32 %v236_v16, %v1174_v54 }
  0x7f   :  { %v252_v39 = vmul.f32 0.6931472, %v765_v20  ;;  %v307_v36 = vadd.f32 14484.914, %v303_v18  ;;  %v332_v37 = vmul.f32 %v328_v19, %v1140_v62  ;;  %v1247_v43 = vmul.f32 0.6931472, %v757_v41 }
  0x80   :  { %v767_v4 = vpop.eup %766  ;;  %v308_v40 = vadd.f32 14484.914, %v304_v24  ;;  %v333_v44 = vadd.f32 175.0, %v329_v50  ;;  %v1251_v5 = vadd.f32 %v1074_v0, %v1114_v38  ;;  %v1254_v47 = vadd.f32 5.5, %v1134_v58 }
  0x81   :  { %v769_v49 = vpop.eup %768  ;;  %v309_v48 = vmul.f32 %v305_v26, %v1129_v52  ;;  %v310_v54 = vmul.f32 %v306_v27, %v1134_v58  ;;  %v334_v53 = vadd.f32 175.0, %v330_v59  ;;  %v1258_v56 = vadd.f32 %v246_v23, %v237_v22 }
  0x82   :  { %1594 = vst [vmem:[#allocation19_spill] sm:$0xff] %v1251_v5  ;;  %v771_v55 = vpop.eup %770  ;;  %v1260_v41 = vadd.f32 %v248_v30, %v238_v25  ;;  %v1263_v60 = vadd.f32 5.5, %v1137_v61  ;;  %v335_v6 = vadd.f32 175.0, %v331_v32  ;;  %v1265_v38 = vadd.f32 %v250_v31, %v239_v28 }
  0x83   :  { %v1267_v63 = vadd.f32 %v252_v39, %v240_v33  ;;  %v311_v10 = vmul.f32 %v307_v36, %v1137_v61  ;;  %v336_v7 = vadd.f32 175.0, %v332_v37  ;;  %v1270_v13 = vmul.f32 0.6931472, %v767_v4 }
  0x84   :  { %v773_v12 = vpop.eup %772  ;;  %v312_v16 = vmul.f32 %v308_v40, %v1140_v62  ;;  %v337_v18 = vmul.f32 %v333_v44, %v1129_v52  ;;  %v1276_v19 = vadd.f32 %v1076_v1, %v1117_v42  ;;  %v313_v20 = vadd.f32 32281.064, %v309_v48 }
  0x85   :  { %1595 = vst [vmem:[#allocation20_spill] sm:$0xff] %v1267_v63  ;;  %v314_v22 = vadd.f32 32281.064, %v310_v54  ;;  %v338_v23 = vmul.f32 %v334_v53, %v1134_v58  ;;  %v1281_v24 = vadd.f32 %v1078_v2, %v1121_v45  ;;  %v1283_v50 = vmul.f32 0.6931472, %v769_v49 }
  0x86   :  { %1596 = vst [vmem:[#allocation21_spill] sm:$0xff] %v1276_v19  ;;  %v339_v25 = vmul.f32 %v335_v6, %v1137_v61  ;;  %v1288_v26 = vadd.f32 %v1080_v3, %v1123_v46  ;;  %v1291_v27 = vadd.f32 1e-10, %v1251_v5  ;;  %v1293_v42 = vmul.f32 0.6931472, %v771_v55 }
  0x87   :  { %1597 = vst [vmem:[#allocation22_spill] sm:$0xff] %v1281_v24  ;;  %v1295_v59 = vmul.f32 0.6931472, %v773_v12  ;;  %v315_v28 = vadd.f32 32281.064, %v311_v10  ;;  %v340_v30 = vmul.f32 %v336_v7, %v1140_v62  ;;  %v1299_v45 = vadd.f32 5.5, %v1140_v62 }
  0x88   :  { %1598 = vst [vmem:[#allocation23_spill] sm:$0xff] %v1288_v26  ;;  %1599 = vst [vmem:[#allocation24_spill] sm:$0xff] %v1293_v42  ;;  %v316_v31 = vadd.f32 32281.064, %v312_v16  ;;  %v341_v32 = vadd.f32 735.0, %v337_v18  ;;  %v317_v46 = vmul.f32 %v313_v20, %v1129_v52  ;;  %v318_v39 = vmul.f32 %v314_v22, %v1134_v58 }
  0x89   :  { %1600 = vst [vmem:[#allocation25_spill] sm:$0xff] %v1295_v59  ;;  %v1302_v33 = vadd.f32 1e-10, %v1276_v19  ;;  %v342_v36 = vadd.f32 735.0, %v338_v23  ;;  %v1307_v37 = vadd.f32 1e-10, %v1281_v24  ;;  %v319_v6 = vmul.f32 %v315_v28, %v1137_v61 }
  0x8a   :  { %v343_v40 = vadd.f32 735.0, %v339_v25  ;;  %v1312_v44 = vadd.f32 1e-10, %v1288_v26  ;;  %v437_v49 = vadd.f32 33.458332, %v1291_v27  ;;  %v344_v55 = vadd.f32 735.0, %v340_v30 }
  0x8b   :  { %v320_v10 = vmul.f32 %v316_v31, %v1140_v62  ;;  %v345_v7 = vmul.f32 %v341_v32, %v1129_v52  ;;  %v438_v12 = vadd.f32 33.458332, %v1302_v33  ;;  %v321_v16 = vadd.f32 29969.594, %v317_v46 }
  0x8c   :  { %v1325_v18 = vadd.f32 29969.594, %v318_v39  ;;  %v346_v20 = vmul.f32 %v342_v36, %v1134_v58  ;;  %v439_v22 = vadd.f32 33.458332, %v1307_v37  ;;  %v347_v23 = vmul.f32 %v343_v40, %v1137_v61 }
  0x8d   :  { %v440_v25 = vadd.f32 33.458332, %v1312_v44  ;;  %v441_v30 = vmul.f32 %v437_v49, %v1291_v27  ;;  %v442_v28 = vmul.f32 %v438_v12, %v1302_v33  ;;  %v348_v31 = vmul.f32 %v344_v55, %v1140_v62 }
  0x8e   :  { %v443_v32 = vmul.f32 %v439_v22, %v1307_v37  ;;  %v481_v46 = vadd.f32 21.0, %v1291_v27  ;;  %v482_v39 = vadd.f32 21.0, %v1302_v33  ;;  %v323_v53 = vadd.f32 29969.594, %v319_v6 }
  0x8f   :  { %v349_v36 = vadd.f32 1624.0, %v345_v7  ;;  %v444_v54 = vmul.f32 %v440_v25, %v1312_v44  ;;  %v445_v48 = vadd.f32 466.3342, %v441_v30  ;;  %v324_v40 = vadd.f32 29969.594, %v320_v10 }
  0x90   :  { %v350_v4 = vadd.f32 1624.0, %v346_v20  ;;  %v446_v26 = vadd.f32 466.3342, %v442_v28  ;;  %v483_v49 = vadd.f32 21.0, %v1307_v37  ;;  %v351_v17 = vadd.f32 1624.0, %v347_v23 }
  0x91   :  { %v1340_v12 = vadd.f32 0.5, %v1129_v52  ;;  %v447_v55 = vadd.f32 466.3342, %v443_v32  ;;  %v484_v22 = vadd.f32 21.0, %v1312_v44  ;;  %v352_v14 = vadd.f32 1624.0, %v348_v31 }
  0x92   :  { %v448_v9 = vadd.f32 466.3342, %v444_v54  ;;  %v485_v6 = vmul.f32 %v481_v46, %v1291_v27  ;;  %v486_v7 = vmul.f32 %v482_v39, %v1302_v33  ;;  %v353_v25 = vmul.f32 %v349_v36, %v1129_v52 }
  0x93   :  { %v1347_v10 = vadd.f32 0.5, %v1134_v58  ;;  %v1350_v20 = vadd.f32 0.5, %v1137_v61  ;;  %v449_v23 = vmul.f32 %v445_v48, %v1291_v27  ;;  %v354_v30 = vmul.f32 %v350_v4, %v1134_v58 }
  0x94   :  { %v1355_v28 = vadd.f32 0.5, %v1140_v62  ;;  %v450_v54 = vmul.f32 %v446_v26, %v1302_v33  ;;  %v487_v31 = vmul.f32 %v483_v49, %v1307_v37  ;;  %v355_v32 = vmul.f32 %v351_v17, %v1137_v61 }
  0x95   :  { %774 = vlog2.f32 %v1144_v11  ;;  %v451_v46 = vmul.f32 %v447_v55, %v1307_v37  ;;  %v488_v39 = vmul.f32 %v484_v22, %v1312_v44  ;;  %v356_v36 = vmul.f32 %v352_v14, %v1140_v62 }
  0x96   :  { %v452_v48 = vmul.f32 %v448_v9, %v1312_v44  ;;  %v489_v4 = vadd.f32 175.0, %v485_v6  ;;  %v490_v8 = vadd.f32 175.0, %v486_v7  ;;  %v357_v24 = vadd.f32 1764.0, %v353_v25 }
  0x97   :  { %776 = vlog2.f32 %v1254_v47  ;;  %v389_v26 = vmul.f32 2.5066283, %v321_v16  ;;  %v453_v19 = vadd.f32 3465.7095, %v449_v23  ;;  %v358_v49 = vadd.f32 1764.0, %v354_v30 }
  0x98   :  { %778 = vlog2.f32 %v1263_v60  ;;  %v454_v17 = vadd.f32 3465.7095, %v450_v54  ;;  %v491_v5 = vadd.f32 175.0, %v487_v31  ;;  %v359_v59 = vadd.f32 1764.0, %v355_v32 }
  0x99   :  { %780 = vlog2.f32 %v1299_v45  ;;  %v455_v55 = vadd.f32 3465.7095, %v451_v46  ;;  %v492_v22 = vadd.f32 175.0, %v488_v39  ;;  %v360_v14 = vadd.f32 1764.0, %v356_v36 }
  0x9a   :  { %v456_v63 = vadd.f32 3465.7095, %v452_v48  ;;  %v493_v9 = vmul.f32 %v489_v4, %v1291_v27  ;;  %v494_v6 = vmul.f32 %v490_v8, %v1302_v33  ;;  %v361_v7 = vmul.f32 %v357_v24, %v1129_v52 }
  0x9b   :  { %v457_v16 = vmul.f32 %v453_v19, %v1291_v27  ;;  %v495_v25 = vmul.f32 %v491_v5, %v1307_v37  ;;  %v496_v23 = vmul.f32 %v492_v22, %v1312_v44  ;;  %v362_v30 = vmul.f32 %v358_v49, %v1134_v58 }
  0x9c   :  { %v458_v54 = vmul.f32 %v454_v17, %v1302_v33  ;;  %v497_v31 = vadd.f32 735.0, %v493_v9  ;;  %v498_v32 = vadd.f32 735.0, %v494_v6  ;;  %v363_v46 = vmul.f32 %v359_v59, %v1137_v61 }
  0x9d   :  { %v390_v39 = vmul.f32 2.5066283, %v1325_v18  ;;  %v459_v8 = vmul.f32 %v455_v55, %v1307_v37  ;;  %v499_v36 = vadd.f32 735.0, %v495_v25  ;;  %v364_v24 = vmul.f32 %v360_v14, %v1140_v62 }
  0x9e   :  { %v391_v19 = vmul.f32 2.5066283, %v323_v53  ;;  %v460_v5 = vmul.f32 %v456_v63, %v1312_v44  ;;  %v500_v48 = vadd.f32 735.0, %v496_v23  ;;  %v365_v22 = vadd.f32 720.0, %v361_v7 }
  0x9f   :  { %v775_v4 = vpop.eup %774  ;;  %v392_v49 = vmul.f32 2.5066283, %v324_v40  ;;  %v461_v42 = vadd.f32 14484.914, %v457_v16  ;;  %v501_v17 = vmul.f32 %v497_v31, %v1291_v27  ;;  %v366_v9 = vadd.f32 720.0, %v362_v30 }
  0xa0   :  { %782 = vlog2.f32 %v389_v26  ;;  %v462_v59 = vadd.f32 14484.914, %v458_v54  ;;  %v502_v18 = vmul.f32 %v498_v32, %v1302_v33  ;;  %v367_v55 = vadd.f32 720.0, %v363_v46 }
  0xa1   :  { %v777_v6 = vpop.eup %776  ;;  %784 = vlog2.f32 %v390_v39  ;;  %v463_v25 = vadd.f32 14484.914, %v459_v8  ;;  %v503_v53 = vmul.f32 %v499_v36, %v1307_v37  ;;  %v368_v63 = vadd.f32 720.0, %v364_v24 }
  0xa2   :  { %v779_v14 = vpop.eup %778  ;;  %786 = vlog2.f32 %v391_v19  ;;  %v464_v23 = vadd.f32 14484.914, %v460_v5  ;;  %v504_v40 = vmul.f32 %v500_v48, %v1312_v44  ;;  %v405_v16 = vmul.f32 %v365_v22, %v1129_v52 }
  0xa3   :  { %v781_v7 = vpop.eup %780  ;;  %788 = vlog2.f32 %v392_v49  ;;  %v465_v26 = vmul.f32 %v461_v42, %v1291_v27  ;;  %v505_v30 = vadd.f32 1624.0, %v501_v17  ;;  %v374_v54 = vmul.f32 0.6931472, %v775_v4 }
  0xa4   :  { %v406_v31 = vmul.f32 %v366_v9, %v1134_v58  ;;  %v466_v32 = vmul.f32 %v462_v59, %v1302_v33  ;;  %v506_v46 = vadd.f32 1624.0, %v502_v18  ;;  %v407_v39 = vmul.f32 %v367_v55, %v1137_v61 }
  0xa5   :  { %v1391_v8 = vadd.f32 5.5, %v1291_v27  ;;  %v467_v36 = vmul.f32 %v463_v25, %v1307_v37  ;;  %v507_v24 = vadd.f32 1624.0, %v503_v53  ;;  %v376_v19 = vmul.f32 0.6931472, %v777_v6 }
  0xa6   :  { %v408_v52 = vmul.f32 %v368_v63, %v1140_v62  ;;  %v468_v42 = vmul.f32 %v464_v23, %v1312_v44  ;;  %v508_v5 = vadd.f32 1624.0, %v504_v40  ;;  %v378_v48 = vmul.f32 0.6931472, %v779_v14 }
  0xa7   :  { %790 = vlog2.f32 %v405_v16  ;;  %v469_v58 = vadd.f32 32281.064, %v465_v26  ;;  %v509_v4 = vmul.f32 %v505_v30, %v1291_v27  ;;  %v381_v22 = vmul.f32 %v374_v54, %v1340_v12 }
  0xa8   :  { %792 = vlog2.f32 %v406_v31  ;;  %v470_v61 = vadd.f32 32281.064, %v466_v32  ;;  %v510_v49 = vmul.f32 %v506_v46, %v1302_v33  ;;  %v380_v17 = vmul.f32 0.6931472, %v781_v7 }
  0xa9   :  { %794 = vlog2.f32 %v407_v39  ;;  %v471_v9 = vadd.f32 32281.064, %v467_v36  ;;  %v511_v59 = vmul.f32 %v507_v24, %v1307_v37  ;;  %v382_v18 = vmul.f32 %v376_v19, %v1347_v10 }
  0xaa   :  { %v783_v62 = vpop.eup %782  ;;  %796 = vlog2.f32 %v408_v52  ;;  %v472_v6 = vadd.f32 32281.064, %v468_v42  ;;  %v512_v55 = vmul.f32 %v508_v5, %v1312_v44  ;;  %v383_v53 = vmul.f32 %v378_v48, %v1350_v20 }
  0xab   :  { %v785_v25 = vpop.eup %784  ;;  %v1404_v12 = vadd.f32 5.5, %v1302_v33  ;;  %v473_v14 = vmul.f32 %v469_v58, %v1291_v27  ;;  %v513_v63 = vadd.f32 1764.0, %v509_v4  ;;  %v1408_v40 = vadd.f32 5.5, %v1307_v37 }
  0xac   :  { %v787_v23 = vpop.eup %786  ;;  %v1411_v7 = vadd.f32 5.5, %v1312_v44  ;;  %v474_v10 = vmul.f32 %v470_v61, %v1302_v33  ;;  %v514_v16 = vadd.f32 1764.0, %v510_v49  ;;  %v384_v30 = vmul.f32 %v380_v17, %v1355_v28 }
  0xad   :  { %v789_v26 = vpop.eup %788  ;;  %v385_v20 = vsub.f32 %v381_v22, %v1144_v11  ;;  %v475_v54 = vmul.f32 %v471_v9, %v1307_v37  ;;  %v515_v31 = vadd.f32 1764.0, %v511_v59  ;;  %v386_v32 = vsub.f32 %v382_v18, %v1254_v47 }
  0xae   :  { %v394_v46 = vmul.f32 0.6931472, %v783_v62  ;;  %v476_v39 = vmul.f32 %v472_v6, %v1312_v44  ;;  %v516_v36 = vadd.f32 1764.0, %v512_v55  ;;  %v387_v24 = vsub.f32 %v383_v53, %v1263_v60 }
  0xaf   :  { %v396_v19 = vmul.f32 0.6931472, %v785_v25  ;;  %v477_v52 = vadd.f32 29969.594, %v473_v14  ;;  %v517_v42 = vmul.f32 %v513_v63, %v1291_v27  ;;  %v398_v5 = vmul.f32 0.6931472, %v787_v23 }
  0xb0   :  { %v478_v48 = vadd.f32 29969.594, %v474_v10  ;;  %v518_v28 = vmul.f32 %v514_v16, %v1302_v33  ;;  %798 = vlog2.f32 %v1391_v8  ;;  %v388_v58 = vsub.f32 %v384_v30, %v1299_v45 }
  0xb1   :  { %v791_v11 = vpop.eup %790  ;;  %v479_v47 = vadd.f32 29969.594, %v475_v54  ;;  %v519_v4 = vmul.f32 %v515_v31, %v1307_v37  ;;  %800 = vlog2.f32 %v1404_v12  ;;  %v400_v60 = vmul.f32 0.6931472, %v789_v26 }
  0xb2   :  { %v793_v22 = vpop.eup %792  ;;  %v480_v61 = vadd.f32 29969.594, %v476_v39  ;;  %v520_v49 = vmul.f32 %v516_v36, %v1312_v44  ;;  %802 = vlog2.f32 %v1408_v40  ;;  %v1428_v9 = vadd.f32 %v394_v46, %v385_v20 }
  0xb3   :  { %v795_v17 = vpop.eup %794  ;;  %v1430_v59 = vadd.f32 %v396_v19, %v386_v32  ;;  %v521_v62 = vadd.f32 720.0, %v517_v42  ;;  %v545_v18 = vmul.f32 2.5066283, %v477_v52  ;;  %v1432_v6 = vmul.f32 0.6931472, %v791_v11 }
  0xb4   :  { %v797_v45 = vpop.eup %796  ;;  %v522_v55 = vadd.f32 720.0, %v518_v28  ;;  %804 = vlog2.f32 %v1411_v7  ;;  %v546_v25 = vmul.f32 2.5066283, %v478_v48  ;;  %v1435_v53 = vadd.f32 %v398_v5, %v387_v24 }
  0xb5   :  { %v412_v14 = vmul.f32 0.6931472, %v793_v22  ;;  %v523_v63 = vadd.f32 720.0, %v519_v4  ;;  %v547_v23 = vmul.f32 2.5066283, %v479_v47  ;;  %v1437_v10 = vadd.f32 %v400_v60, %v388_v58 }
  0xb6   :  { %v414_v16 = vmul.f32 0.6931472, %v795_v17  ;;  %v524_v26 = vadd.f32 720.0, %v520_v49  ;;  %v548_v30 = vmul.f32 2.5066283, %v480_v61  ;;  %806 = vlog2.f32 %v545_v18 }
  0xb7   :  { %v416_v20 = vmul.f32 0.6931472, %v797_v45  ;;  %v561_v54 = vmul.f32 %v521_v62, %v1291_v27  ;;  %v625_v31 = vsub.f32 %v1194_v29, %v1216_v21  ;;  %v417_v32 = vsub.f32 %v1428_v9, %v1432_v6 }
  0xb8   :  { %808 = vlog2.f32 %v546_v25  ;;  %v562_v46 = vmul.f32 %v522_v55, %v1302_v33  ;;  %v626_v39 = vsub.f32 %v1198_v34, %v1231_v35  ;;  %v418_v36 = vsub.f32 %v1430_v59, %v412_v14  ;;  %v1469_v55 = vld [vmem:[#allocation8] sm:$0xff] }
  0xb9   :  { %810 = vlog2.f32 %v547_v23  ;;  %v563_v24 = vmul.f32 %v523_v63, %v1307_v37  ;;  %v627_v19 = vsub.f32 %v1202_v51, %v1234_v15  ;;  %v419_v42 = vsub.f32 %v1435_v53, %v414_v16  ;;  %v1472_v63 = vld [vmem:[#allocation8 + $0x8] sm:$0xff] }
  0xba   :  { %v799_v52 = vpop.eup %798  ;;  %812 = vlog2.f32 %v548_v30  ;;  %v564_v5 = vmul.f32 %v524_v26, %v1312_v44  ;;  %v628_v48 = vsub.f32 %v1205_v57, %v1247_v43  ;;  %v420_v11 = vsub.f32 %v1437_v10, %v416_v20  ;;  %v1603_v26 = vld [vmem:[#allocation24_spill] sm:$0xff] }
  0xbb   :  { %v801_v28 = vpop.eup %800  ;;  %v525_v58 = vadd.f32 0.5, %v1291_v27  ;;  %814 = vlog2.f32 %v561_v54  ;;  %v629_v47 = vmul.f32 %v625_v31, %v1074_v0  ;;  %v526_v22 = vadd.f32 0.5, %v1302_v33  ;;  %v1605_v54 = vld [vmem:[#allocation20_spill] sm:$0xff]  ;;  %v1606_v31 = vld [vmem:[#allocation25_spill] sm:$0xff] }
  0xbc   :  { %v803_v4 = vpop.eup %802  ;;  %816 = vlog2.f32 %v562_v46  ;;  %v630_v60 = vmul.f32 %v626_v39, %v1076_v1  ;;  %v631_v61 = vmul.f32 %v627_v19, %v1078_v2  ;;  %v530_v49 = vmul.f32 0.6931472, %v799_v52  ;;  %v1498_v46 = vld [vmem:[#allocation8 + $0x18] sm:$0xff]  ;;  %v1608_v39 = vld [vmem:[#allocation19_spill] sm:$0xff] }
  0xbd   :  { %818 = vlog2.f32 %v563_v24  ;;  %v632_v17 = vmul.f32 %v628_v48, %v1080_v3  ;;  %v633_v9 = vmul.f32 1.442695, %v629_v47  ;;  %v532_v62 = vmul.f32 0.6931472, %v801_v28  ;;  %v1609_v24 = vld [vmem:[#allocation21_spill] sm:$0xff] }
  0xbe   :  { %v805_v59 = vpop.eup %804  ;;  %820 = vlog2.f32 %v564_v5  ;;  %v635_v27 = vmul.f32 1.442695, %v630_v60  ;;  %v637_v18 = vmul.f32 1.442695, %v631_v61  ;;  %v527_v0 = vadd.f32 0.5, %v1307_v37 }
  0xbf   :  { %v534_v45 = vmul.f32 0.6931472, %v803_v4  ;;  %822 = vpow2.f32 %v633_v9  ;;  %v639_v33 = vmul.f32 1.442695, %v632_v17  ;;  %v581_v1 = vsub.f32 %v1216_v21, %v1194_v29 }
  0xc0   :  { %v582_v2 = vsub.f32 %v1231_v35, %v1198_v34  ;;  %v583_v3 = vsub.f32 %v1234_v15, %v1202_v51  ;;  %824 = vpow2.f32 %v635_v27  ;;  %v807_v6 = vpop.eup %806  ;;  %v528_v25 = vadd.f32 0.5, %v1312_v44  ;;  %v1484_v44 = vld [vmem:[#allocation8 + $0x10] sm:$0xff] }
  0xc1   :  { %v536_v53 = vmul.f32 0.6931472, %v805_v59  ;;  %v537_v37 = vmul.f32 %v530_v49, %v525_v58  ;;  %826 = vpow2.f32 %v637_v18  ;;  %v1601_v21 = vsub.f32 %v1258_v56, %v1270_v13  ;;  %v1611_v18 = vld [vmem:[#allocation15_spill] sm:$0xff] }
  0xc2   :  { %v809_v14 = vpop.eup %808  ;;  %v1602_v35 = vsub.f32 %v1260_v41, %v1283_v50  ;;  %v538_v10 = vmul.f32 %v532_v62, %v526_v22  ;;  %828 = vpow2.f32 %v639_v33  ;;  %v1604_v30 = vsub.f32 %v1265_v38, %v1603_v26  ;;  %v1610_v38 = vld [vmem:[#allocation22_spill] sm:$0xff]  ;;  %v1613_v33 = vld [vmem:[#allocation17_spill] sm:$0xff] }
  0xc3   :  { %v1477_v23 = vadd.f32 %v417_v32, %v1601_v21  ;;  %v811_v16 = vpop.eup %810  ;;  %v1607_v56 = vsub.f32 %v1605_v54, %v1606_v31  ;;  %v539_v32 = vmul.f32 %v534_v45, %v527_v0  ;;  %v584_v41 = vsub.f32 %v1247_v43, %v1205_v57  ;;  %v1612_v0 = vld [vmem:[#allocation16_spill] sm:$0xff] }
  0xc4   :  { %v1482_v15 = vadd.f32 %v418_v36, %v1602_v35  ;;  %v1489_v20 = vadd.f32 %v419_v42, %v1604_v30  ;;  %v813_v50 = vpop.eup %812  ;;  %v1501_v36 = vmul.f32 %v581_v1, %v1608_v39  ;;  %v1504_v19 = vmul.f32 %v582_v2, %v1609_v24 }
  0xc5   :  { %v1494_v13 = vadd.f32 %v420_v11, %v1607_v56  ;;  %v1507_v52 = vmul.f32 %v583_v3, %v1610_v38  ;;  %v605_v42 = vsub.f32 1.0, %v1469_v55  ;;  %v815_v5 = vpop.eup %814  ;;  %v540_v48 = vmul.f32 %v536_v53, %v528_v25 }
  0xc6   :  { %v541_v28 = vsub.f32 %v537_v37, %v1391_v8  ;;  %v550_v11 = vmul.f32 0.6931472, %v807_v6  ;;  %v606_v58 = vsub.f32 1.0, %v1472_v63  ;;  %v817_v47 = vpop.eup %816  ;;  %v542_v4 = vsub.f32 %v538_v10, %v1404_v12 }
  0xc7   :  { %v552_v22 = vmul.f32 0.6931472, %v809_v14  ;;  %v607_v60 = vsub.f32 1.0, %v1484_v44  ;;  %v609_v61 = vadd.f32 1e-10, %v605_v42  ;;  %v819_v49 = vpop.eup %818  ;;  %v543_v17 = vsub.f32 %v539_v32, %v1408_v40  ;;  %v1614_v40 = vld [vmem:[#allocation18_spill] sm:$0xff] }
  0xc8   :  { %v554_v9 = vmul.f32 0.6931472, %v811_v16  ;;  %v608_v59 = vsub.f32 1.0, %v1498_v46  ;;  %v610_v62 = vadd.f32 1e-10, %v606_v58  ;;  %v821_v27 = vpop.eup %820  ;;  %v589_v8 = vsub.f32 %v1194_v29, %v1611_v18 }
  0xc9   :  { %v590_v45 = vsub.f32 %v1198_v34, %v1612_v0  ;;  %v591_v12 = vsub.f32 %v1202_v51, %v1613_v33  ;;  %v611_v1 = vadd.f32 1e-10, %v607_v60  ;;  %v823_v2 = vpop.eup %822  ;;  %v544_v3 = vsub.f32 %v540_v48, %v1411_v7 }
  0xca   :  { %v557_v6 = vadd.f32 %v550_v11, %v541_v28  ;;  %v592_v25 = vsub.f32 %v1205_v57, %v1614_v40  ;;  %v612_v53 = vadd.f32 1e-10, %v608_v59  ;;  %v825_v37 = vpop.eup %824  ;;  %v556_v14 = vmul.f32 0.6931472, %v813_v50 }
  0xcb   :  { %v558_v21 = vadd.f32 %v552_v22, %v542_v4  ;;  %830 = vlog2.f32 %v609_v61  ;;  %v641_v29 = vmul.f32 %v823_v2, %v605_v42  ;;  %v827_v35 = vpop.eup %826  ;;  %v559_v10 = vadd.f32 %v554_v9, %v543_v17  ;;  %v1528_v42 = vld [vmem:[#allocation2] sm:$0xff]  ;;  %v1615_v9 = vld [vmem:[#allocation23_spill] sm:$0xff] }
  0xcc   :  { %v566_v34 = vmul.f32 0.6931472, %v815_v5  ;;  %832 = vlog2.f32 %v610_v62  ;;  %v642_v16 = vmul.f32 %v825_v37, %v606_v58  ;;  %v829_v51 = vpop.eup %828  ;;  %v568_v26 = vmul.f32 0.6931472, %v817_v47  ;;  %v1532_v58 = vld [vmem:[#allocation2 + $0x8] sm:$0xff]  ;;  %v849_v62 = vld [vmem:[#allocation2 + $0x18] sm:$0xff] }
  0xcd   :  { %834 = vlog2.f32 %v611_v1  ;;  %v643_v30 = vmul.f32 %v827_v35, %v607_v60  ;;  %v645_v7 = vadd.f32 %v641_v29, %v1469_v55  ;;  %v570_v54 = vmul.f32 0.6931472, %v819_v49  ;;  %v1535_v60 = vld [vmem:[#allocation2 + $0x10] sm:$0xff] }
  0xce   :  { %836 = vlog2.f32 %v612_v53  ;;  %v644_v31 = vmul.f32 %v829_v51, %v608_v59  ;;  %v646_v56 = vadd.f32 %v642_v16, %v1472_v63  ;;  %v560_v32 = vadd.f32 %v556_v14, %v544_v3 }
  0xcf   :  { %v572_v50 = vmul.f32 0.6931472, %v821_v27  ;;  %v647_v39 = vadd.f32 %v643_v30, %v1484_v44  ;;  %v649_v24 = vadd.f32 1e-10, %v645_v7  ;;  %v573_v38 = vsub.f32 %v557_v6, %v566_v34 }
  0xd0   :  { %v593_v5 = vmul.f32 %v1528_v42, %v589_v8  ;;  %v648_v48 = vadd.f32 %v644_v31, %v1498_v46  ;;  %v650_v28 = vadd.f32 1e-10, %v646_v56  ;;  %v574_v11 = vsub.f32 %v558_v21, %v568_v26 }
  0xd1   :  { %v594_v47 = vmul.f32 %v1532_v58, %v590_v45  ;;  %v651_v4 = vadd.f32 1e-10, %v647_v39  ;;  %838 = vlog2.f32 %v649_v24  ;;  %v575_v22 = vsub.f32 %v559_v10, %v570_v54 }
  0xd2   :  { %v595_v61 = vmul.f32 %v1535_v60, %v591_v12  ;;  %v652_v49 = vadd.f32 1e-10, %v648_v48  ;;  %840 = vlog2.f32 %v650_v28  ;;  %v576_v17 = vsub.f32 %v560_v32, %v572_v50 }
  0xd3   :  { %v588_v59 = vmul.f32 %v584_v41, %v1615_v9  ;;  %v596_v27 = vmul.f32 %v849_v62, %v592_v25  ;;  %842 = vlog2.f32 %v651_v4  ;;  %v577_v18 = vsub.f32 %v1477_v23, %v573_v38 }
  0xd4   :  { %v597_v8 = vadd.f32 %v593_v5, %v1501_v36  ;;  %844 = vlog2.f32 %v652_v49  ;;  %v578_v45 = vsub.f32 %v1482_v15, %v574_v11  ;;  %v598_v33 = vadd.f32 %v594_v47, %v1504_v19 }
  0xd5   :  { %v831_v0 = vpop.eup %830  ;;  %v579_v1 = vsub.f32 %v1489_v20, %v575_v22  ;;  %v599_v2 = vadd.f32 %v595_v61, %v1507_v52  ;;  %v580_v43 = vsub.f32 %v1494_v13, %v576_v17  ;;  %v600_v41 = vadd.f32 %v596_v27, %v588_v59 }
  0xd6   :  { %v833_v12 = vpop.eup %832  ;;  %v601_v6 = vadd.f32 %v597_v8, %v577_v18  ;;  %v614_v23 = vmul.f32 0.6931472, %v831_v0  ;;  %v602_v40 = vadd.f32 %v598_v33, %v578_v45  ;;  %v673_v25 = vmul.f32 %v1469_v55, %v1469_v55 }
  0xd7   :  { %v835_v57 = vpop.eup %834  ;;  %v616_v36 = vmul.f32 0.6931472, %v833_v12  ;;  %v603_v15 = vadd.f32 %v599_v2, %v579_v1  ;;  %v674_v19 = vmul.f32 %v1472_v63, %v1472_v63  ;;  %v604_v37 = vadd.f32 %v600_v41, %v580_v43 }
  0xd8   :  { %v837_v3 = vpop.eup %836  ;;  %v618_v53 = vmul.f32 0.6931472, %v835_v57  ;;  %vm665_vm0 = vcmp.le.f32.partialorder %v1528_v42, 1e-08  ;;  %v675_v13 = vmul.f32 %v1484_v44, %v1484_v44  ;;  %v621_v21 = vsub.f32 %v601_v6, %v614_v23 }
  0xd9   :  { %v620_v52 = vmul.f32 0.6931472, %v837_v3  ;;  %vm666_vm1 = vcmp.le.f32.partialorder %v1532_v58, 1e-08  ;;  %v676_v55 = vmul.f32 %v1498_v46, %v1498_v46  ;;  %v622_v10 = vsub.f32 %v602_v40, %v616_v36 }
  0xda   :  { %vm667_vm2 = vcmp.le.f32.partialorder %v1535_v60, 1e-08  ;;  %v677_v63 = vmul.f32 0.5, %v673_v25  ;;  %v623_v51 = vsub.f32 %v603_v15, %v618_v53  ;;  %v678_v7 = vmul.f32 0.5, %v674_v19 }
  0xdb   :  { %v839_v20 = vpop.eup %838  ;;  %v624_v44 = vsub.f32 %v604_v37, %v620_v52  ;;  %v679_v56 = vmul.f32 0.5, %v675_v13  ;;  %vm668_vm3 = vcmp.le.f32.partialorder %v849_v62, 1e-08  ;;  %v680_v50 = vmul.f32 0.5, %v676_v55 }
  0xdc   :  { %v841_v14 = vpop.eup %840  ;;  %v654_v29 = vmul.f32 0.6931472, %v839_v20 }
  0xdd   :  { %v843_v35 = vpop.eup %842  ;;  %v656_v34 = vmul.f32 0.6931472, %v841_v14 }
  0xde   :  { %v845_v16 = vpop.eup %844  ;;  %v658_v26 = vmul.f32 0.6931472, %v843_v35  ;;  %v661_v30 = vsub.f32 0.0, %v654_v29 }
  0xdf   :  { %v660_v54 = vmul.f32 0.6931472, %v845_v16  ;;  %v662_v31 = vsub.f32 0.0, %v656_v34 }
  0xe0   :  { %v663_v32 = vsub.f32 0.0, %v658_v26  ;;  %v669_v46 = vsel %vm665_vm0, %v661_v30, %v621_v21 }
  0xe1   :  { %v664_v39 = vsub.f32 0.0, %v660_v54  ;;  %v670_v24 = vsel %vm666_vm1, %v662_v31, %v622_v10  ;;  %v681_v38 = vadd.f32 %v677_v63, %v669_v46 }
  0xe2   :  { %v671_v5 = vsel %vm667_vm2, %v663_v32, %v623_v51  ;;  %v682_v48 = vadd.f32 %v678_v7, %v670_v24 }
  0xe3   :  { %v672_v28 = vsel %vm668_vm3, %v664_v39, %v624_v44  ;;  %v683_v11 = vadd.f32 %v679_v56, %v671_v5 }
  0xe4   :  { %v684_v47 = vadd.f32 %v680_v50, %v672_v28 }
  0xe5   :  { %v698_v4 = vadd.f32 %v683_v11, %v681_v38 }
  0xe6   :  { %v699_v22 = vadd.f32 %v684_v47, %v682_v48 }
  0xe7   :  { %700 = vst [vmem:[#allocation10] sm:$0xff] %v698_v4 }
  0xe8   :  { %701 = vst [vmem:[#allocation10 + $0x8] sm:$0xff] %v699_v22 }
  0xe9   :  { %949 = shalt.err (!%p946_p8)
}
  0xea   :  { %s950_s13 = scalar_lea.hbm %s1582_s4, 256 }
  0xeb   :  { %p951_p9 = scmp.ne.s32.totalorder %s1582_s4, %s950_s13  ;;  %p954_p10 = scmp.lt.u32.totalorder %s950_s13, %s1582_s4 }
  0xed   :  { %p956_p11 = pnand %p954_p10, %p951_p9 }
  0xef   :  { %959 = shalt.err (!%p956_p11)
}
  0xf0   :  { %711 = dma.vmem_to_hbm [thread:$0]  %s709_s27, 256, %s1582_s4, [#allocation4]  }
  0xf1   :  { %966 = dma.done.wait [#allocation4], 256  }
  0xf2   :  { %967 = vsyncadd [#allocation4], 4294967040 }
  0xf3   :  { %715 = vsyncpa [#allocation3], 1 }
  0xf4   :  { %716 = vsyncpa [#allocation6], 1 }
  0xf5   :  { %717 = vsyncpa [#allocation9], 1 }
  0xf6   :  { %718 = vsyncpa [#allocation4], 1 }

</bundles_post_ra>
